<compile_context>
chip_gen: v7x
topology: tpu7x:2x2x1
jax: 0.10.0
libtpu: 0.0.40
codegen_flags: <defaults>
</compile_context>

<pallas_src>
import functools

import jax
import jax.numpy as jnp
from jax import lax
from jax.experimental import pallas as pl
from jax.experimental.pallas import tpu as pltpu


# ---------------------------------------------------------------------------
# Fused GWNet kernel: prop-matrix + layer1 + layer2 + mean aggregation.
# ---------------------------------------------------------------------------
def _make_gwnet_kernel(n, k_supports, aggregate):
    def kernel(a_ref, z_ref, xc_ref, w1_ref, w2_ref, o_ref):
        # ---- propagation matrix M^T (shared by both layers), no transposes ----
        z = z_ref[...]                                                # (n, dz)
        # R = relu(Z @ Z^T) via dot_general (contract last dims, no .T op)
        r = lax.dot_general(z, z, (((1,), (1,)), ((), ())),
                            preferred_element_type=jnp.float32)       # (n, n)
        r = jnp.maximum(r, 0.0)
        # Az = softmax(R, axis=0), numerically stable, exact divide
        col_max = jnp.max(r, axis=0, keepdims=True)
        e = jnp.exp(r - col_max)
        az = e / jnp.sum(e, axis=0, keepdims=True)                    # (n, n)

        rows = lax.broadcasted_iota(jnp.int32, (n, n), 0)
        cols = lax.broadcasted_iota(jnp.int32, (n, n), 1)
        eye = (rows == cols).astype(jnp.float32)

        # M^T = (1-K) I + Az + sum_k (A_k + 2 A_k A_k)   (K static, unrolled)
        mt = (1.0 - k_supports) * eye + az
        for i in range(k_supports):
            a_i = a_ref[i]                                            # (n, n)
            mt = mt + a_i + 2.0 * jnp.dot(a_i, a_i,
                                          preferred_element_type=jnp.float32)

        # ---- layer 1: Y1 = relu(M^T @ Xc @ blockdiag(W1)) -------------------
        # xc columns are [b0: d cols | b1: d cols | ...] -> batch folded into
        # the MXU free (lane) dimension; block-diag weight keeps it folded.
        t1 = jnp.dot(mt, xc_ref[...],
                     preferred_element_type=jnp.float32)              # (n, B*d)
        y1 = jnp.maximum(
            jnp.dot(t1, w1_ref[...], preferred_element_type=jnp.float32),
            0.0)                                                      # (n, B*h0)

        # ---- layer 2: Y2 = relu(M^T @ Y1 @ blockdiag(W2)) -------------------
        t2 = jnp.dot(mt, y1, preferred_element_type=jnp.float32)      # (n, B*h0)
        y2 = jnp.maximum(
            jnp.dot(t2, w2_ref[...], preferred_element_type=jnp.float32),
            0.0)                                                      # (n, B*h1)

        if aggregate:
            # mean over nodes -> lane-dense (1, B*h1) row
            o_ref[...] = jnp.mean(y2, axis=0, keepdims=True)
        else:
            o_ref[...] = y2                                           # (n, B*h1)

    return kernel


@functools.partial(jax.jit, static_argnames=("aggregate",))
def gwnet_forward(a, x, z, w1, w2, aggregate=True):
    """Fused GWNet forward.  a:(K,n,n) x:(B,d,n) z:(n,dz) w1:(d,h0) w2:(h0,h1)."""
    b, d, n = x.shape
    k = a.shape[0]
    h0 = w1.shape[1]
    h1 = w2.shape[1]

    # One-time XLA-side relayout: node-major, batch folded into columns
    #   xc[node, b*d + j] = x[b, j, node]
    xc = jnp.transpose(x, (2, 0, 1)).reshape(n, b * d).astype(jnp.float32)

    # Block-diagonal weights (B copies of W on the diagonal) so each layer's
    # weight application is a single lane-contiguous matmul with no in-kernel
    # slicing.  Cheap at small B; see TODO below for very large batch.
    eye_b = jnp.eye(b, dtype=jnp.float32)
    w1_bd = jnp.kron(eye_b, w1.astype(jnp.float32))                   # (B*d,  B*h0)
    w2_bd = jnp.kron(eye_b, w2.astype(jnp.float32))                   # (B*h0, B*h1)

    kernel = _make_gwnet_kernel(n, k, aggregate)
    out_shape = (jax.ShapeDtypeStruct((1, b * h1), jnp.float32) if aggregate
                 else jax.ShapeDtypeStruct((n, b * h1), jnp.float32))

    out = pl.pallas_call(
        kernel,
        out_shape=out_shape,
        compiler_params=pltpu.CompilerParams(
            vmem_limit_bytes=32 * 1024 * 1024),
    )(a.astype(jnp.float32), z.astype(jnp.float32), xc, w1_bd, w2_bd)

    if aggregate:
        return out.reshape(b, h1)
    # (n, B*h1) -> (B, h1, n) module layout
    return jnp.transpose(out.reshape(n, b, h1), (1, 2, 0))


# ---------------------------------------------------------------------------
# Pure-JAX reference (mirrors the PyTorch code path literally)
# ---------------------------------------------------------------------------
def gwnet_reference(a, x, z, w1, w2):
    az = jax.nn.softmax(jnp.maximum(z @ z.T, 0.0), axis=0)

    def layer(xin, w):
        B, d, n = xin.shape
        x0 = xin.reshape(-1, n)
        s = x0
        for k in range(a.shape[0]):
            x1 = (a[k] @ x0.T).T
            x2 = 2.0 * (a[k] @ x1.T).T - x0
            s = s + x1 + x2
        s = s + (az @ x0.T).T
        s = s.reshape(B, d, n).transpose(0, 2, 1)        # (B, n, d)
        out = s @ w                                      # (B, n, out)
        return jnp.maximum(out.transpose(0, 2, 1), 0.0)  # (B, out, n)

    h = layer(x, w1)
    h = layer(h, w2)
    return jnp.mean(h, axis=2)


if __name__ == "__main__":
    B, n, d_in, dz = 2, 16, 4, 8
    hidden = (32, 32)
    K = 2  # number of adjacency supports

    key = jax.random.PRNGKey(0)
    k_a, k_x, k_z, k_w1, k_w2 = jax.random.split(key, 5)

    # deterministic synthetic inputs / parameters (uniform init as in the module)
    A = jax.random.uniform(k_a, (K, n, n), jnp.float32) / n
    X = jax.random.normal(k_x, (B, d_in, n), jnp.float32)
    Z = jax.random.normal(k_z, (n, dz), jnp.float32)
    stdv1 = 1.0 / jnp.sqrt(hidden[0])
    stdv2 = 1.0 / jnp.sqrt(hidden[1])
    W1 = jax.random.uniform(k_w1, (d_in, hidden[0]), jnp.float32, -stdv1, stdv1)
    W2 = jax.random.uniform(k_w2, (hidden[0], hidden[1]), jnp.float32, -stdv2, stdv2)

    out = gwnet_forward(A, X, Z, W1, W2, aggregate=True)
    out = jax.block_until_ready(out)

    ref = gwnet_reference(A, X, Z, W1, W2)
    assert out.shape == (B, hidden[1]), out.shape
    assert jnp.allclose(out, ref, rtol=1e-4, atol=1e-4), \
        f"max abs err {jnp.max(jnp.abs(out - ref))}"

    # TODO(synk): torch.sparse.mm is handled with dense adjacency matmuls;
    # nn.Dropout is defined but never used in the reference forward, so omitted
    # (args.act defaults to relu here, matching the module's else-branch).
    # TODO(synk): the block-diagonal weight trick costs B x extra FLOPs in the
    # two weight matmuls; at small B (and tiles << 128x128 MXU granularity)
    # it is strictly cheaper than B per-batch matmuls + column slices, but for
    # very large batch switch back to a batched (per-b) formulation.
    # TODO(synk): operands kept in f32 (not bf16) to hold the 1e-4 tolerance.
    print("KERNEL_OK")
</pallas_src>

<mosaic_0001>
module attributes {stable_mosaic.version = 11 : i64} {
  func.func @kernel(%arg0: memref<2x16x16xf32, #tpu.memory_space<vmem>>, %arg1: memref<16x8xf32, #tpu.memory_space<vmem>>, %arg2: memref<16x8xf32, #tpu.memory_space<vmem>>, %arg3: memref<8x64xf32, #tpu.memory_space<vmem>>, %arg4: memref<64x64xf32, #tpu.memory_space<vmem>>, %arg5: memref<1x64xf32, #tpu.memory_space<vmem>>) attributes {dimension_semantics = [], scalar_prefetch = 0 : i64, scratch_operands = 0 : i64, tpu.core_type = #tpu.core_type<tc>} {
    %c0 = arith.constant 0 : index
    %c0_0 = arith.constant 0 : index
    %0 = vector.load %arg1[%c0, %c0_0] : memref<16x8xf32, #tpu.memory_space<vmem>>, vector<16x8xf32>
    %cst = arith.constant dense<0.000000e+00> : vector<16x16xf32>
    %1 = tpu.matmul %0, %0, %cst {dimension_numbers = #tpu.dot_dimension_numbers<[1], [1], [0], [0], [0, 0, 1, 0], [], []>} : vector<16x8xf32>, vector<16x8xf32>, vector<16x16xf32> -> vector<16x16xf32>
    %cst_1 = arith.constant 0.000000e+00 : f32
    %2 = vector.broadcast %cst_1 : f32 to vector<16x16xf32>
    %3 = arith.maximumf %1, %2 : vector<16x16xf32>
    %cst_2 = arith.constant dense<0xFF800000> : vector<16xf32>
    %4 = vector.multi_reduction <maximumf>, %3, %cst_2 [0] : vector<16x16xf32> to vector<16xf32>
    %5 = vector.shape_cast %4 : vector<16xf32> to vector<1x16xf32>
    %6 = vector.broadcast %5 : vector<1x16xf32> to vector<16x16xf32>
    %7 = arith.subf %3, %6 : vector<16x16xf32>
    %8 = math.exp %7 : vector<16x16xf32>
    %cst_3 = arith.constant dense<0.000000e+00> : vector<16xf32>
    %9 = vector.multi_reduction <add>, %8, %cst_3 [0] : vector<16x16xf32> to vector<16xf32>
    %10 = vector.shape_cast %9 : vector<16xf32> to vector<1x16xf32>
    %11 = vector.broadcast %10 : vector<1x16xf32> to vector<16x16xf32>
    %12 = arith.divf %8, %11 : vector<16x16xf32>
    %13 = tpu.iota {dimensions = array<i32: 0>} : vector<16x16xi32>
    %14 = tpu.iota {dimensions = array<i32: 1>} : vector<16x16xi32>
    %15 = arith.cmpi eq, %13, %14 : vector<16x16xi32>
    %16 = arith.extui %15 : vector<16x16xi1> to vector<16x16xi32>
    %17 = arith.sitofp %16 : vector<16x16xi32> to vector<16x16xf32>
    %cst_4 = arith.constant -1.000000e+00 : f32
    %18 = vector.broadcast %cst_4 : f32 to vector<16x16xf32>
    %19 = arith.mulf %18, %17 : vector<16x16xf32>
    %20 = arith.addf %19, %12 : vector<16x16xf32>
    %c0_5 = arith.constant 0 : index
    %c0_6 = arith.constant 0 : index
    %c0_7 = arith.constant 0 : index
    %21 = vector.load %arg0[%c0_5, %c0_6, %c0_7] : memref<2x16x16xf32, #tpu.memory_space<vmem>>, vector<1x16x16xf32>
    %22 = vector.shape_cast %21 : vector<1x16x16xf32> to vector<16x16xf32>
    %23 = arith.addf %20, %22 : vector<16x16xf32>
    %cst_8 = arith.constant dense<0.000000e+00> : vector<16x16xf32>
    %24 = tpu.matmul %22, %22, %cst_8 {dimension_numbers = #tpu.dot_dimension_numbers<[1], [0], [0], [1], [0, 0, 1, 1], [], []>} : vector<16x16xf32>, vector<16x16xf32>, vector<16x16xf32> -> vector<16x16xf32>
    %cst_9 = arith.constant 2.000000e+00 : f32
    %25 = vector.broadcast %cst_9 : f32 to vector<16x16xf32>
    %26 = arith.mulf %25, %24 : vector<16x16xf32>
    %27 = arith.addf %23, %26 : vector<16x16xf32>
    %c1 = arith.constant 1 : index
    %c0_10 = arith.constant 0 : index
    %c0_11 = arith.constant 0 : index
    %28 = vector.load %arg0[%c1, %c0_10, %c0_11] : memref<2x16x16xf32, #tpu.memory_space<vmem>>, vector<1x16x16xf32>
    %29 = vector.shape_cast %28 : vector<1x16x16xf32> to vector<16x16xf32>
    %30 = arith.addf %27, %29 : vector<16x16xf32>
    %cst_12 = arith.constant dense<0.000000e+00> : vector<16x16xf32>
    %31 = tpu.matmul %29, %29, %cst_12 {dimension_numbers = #tpu.dot_dimension_numbers<[1], [0], [0], [1], [0, 0, 1, 1], [], []>} : vector<16x16xf32>, vector<16x16xf32>, vector<16x16xf32> -> vector<16x16xf32>
    %cst_13 = arith.constant 2.000000e+00 : f32
    %32 = vector.broadcast %cst_13 : f32 to vector<16x16xf32>
    %33 = arith.mulf %32, %31 : vector<16x16xf32>
    %34 = arith.addf %30, %33 : vector<16x16xf32>
    %c0_14 = arith.constant 0 : index
    %c0_15 = arith.constant 0 : index
    %35 = vector.load %arg2[%c0_14, %c0_15] : memref<16x8xf32, #tpu.memory_space<vmem>>, vector<16x8xf32>
    %cst_16 = arith.constant dense<0.000000e+00> : vector<16x8xf32>
    %36 = tpu.matmul %34, %35, %cst_16 {dimension_numbers = #tpu.dot_dimension_numbers<[1], [0], [0], [1], [0, 0, 1, 1], [], []>} : vector<16x16xf32>, vector<16x8xf32>, vector<16x8xf32> -> vector<16x8xf32>
    %c0_17 = arith.constant 0 : index
    %c0_18 = arith.constant 0 : index
    %37 = vector.load %arg3[%c0_17, %c0_18] : memref<8x64xf32, #tpu.memory_space<vmem>>, vector<8x64xf32>
    %cst_19 = arith.constant dense<0.000000e+00> : vector<16x64xf32>
    %38 = tpu.matmul %36, %37, %cst_19 {dimension_numbers = #tpu.dot_dimension_numbers<[1], [0], [0], [1], [0, 0, 1, 1], [], []>} : vector<16x8xf32>, vector<8x64xf32>, vector<16x64xf32> -> vector<16x64xf32>
    %cst_20 = arith.constant 0.000000e+00 : f32
    %39 = vector.broadcast %cst_20 : f32 to vector<16x64xf32>
    %40 = arith.maximumf %38, %39 : vector<16x64xf32>
    %cst_21 = arith.constant dense<0.000000e+00> : vector<16x64xf32>
    %41 = tpu.matmul %34, %40, %cst_21 {dimension_numbers = #tpu.dot_dimension_numbers<[1], [0], [0], [1], [0, 0, 1, 1], [], []>} : vector<16x16xf32>, vector<16x64xf32>, vector<16x64xf32> -> vector<16x64xf32>
    %c0_22 = arith.constant 0 : index
    %c0_23 = arith.constant 0 : index
    %42 = vector.load %arg4[%c0_22, %c0_23] : memref<64x64xf32, #tpu.memory_space<vmem>>, vector<64x64xf32>
    %cst_24 = arith.constant dense<0.000000e+00> : vector<16x64xf32>
    %43 = tpu.matmul %41, %42, %cst_24 {dimension_numbers = #tpu.dot_dimension_numbers<[1], [0], [0], [1], [0, 0, 1, 1], [], []>} : vector<16x64xf32>, vector<64x64xf32>, vector<16x64xf32> -> vector<16x64xf32>
    %cst_25 = arith.constant 0.000000e+00 : f32
    %44 = vector.broadcast %cst_25 : f32 to vector<16x64xf32>
    %45 = arith.maximumf %43, %44 : vector<16x64xf32>
    %cst_26 = arith.constant dense<0.000000e+00> : vector<64xf32>
    %46 = vector.multi_reduction <add>, %45, %cst_26 [0] : vector<16x64xf32> to vector<64xf32>
    %47 = vector.shape_cast %46 : vector<64xf32> to vector<1x64xf32>
    %cst_27 = arith.constant 1.600000e+01 : f32
    %48 = vector.broadcast %cst_27 : f32 to vector<1x64xf32>
    %49 = arith.divf %47, %48 : vector<1x64xf32>
    %c0_28 = arith.constant 0 : index
    %c0_29 = arith.constant 0 : index
    %50 = vector.load %arg5[%c0_28, %c0_29] : memref<1x64xf32, #tpu.memory_space<vmem>>, vector<1x64xf32>
    tpu.vector_store %arg5[%c0_28, %c0_29], %49 {strides = array<i32>} : memref<1x64xf32, #tpu.memory_space<vmem>>, vector<1x64xf32>,
    return
  }
}

</mosaic_0001>

<bundles_post_ra>
// kernel: gwnet_forward.1
= control target key start
LH: loop header
LB: loop body
LE: loop exit
PB: predicated region body
PF: predicated region fallthrough
CT: control target
= control target key end

     0   :  { %vm22_vm0 = vcmask 64512   ;;  %vm106_vm2 = vcmask 130048   ;;  %v134_v41 = vlaneseq  ;;  %v836_v49 = vmov 0.0   ;;  %s959_s1 = inlined_call_operand.vmem [shape: f32[16,8], index: 1, kind: input, shape index: {}]   ;;  %s960_s0 = inlined_call_operand.vmem [shape: f32[2,16,16], index: 0, kind: input, shape index: {}]   ;;  %s961_s2 = inlined_call_operand.vmem [shape: f32[16,8], index: 2, kind: input, shape index: {}]   ;;  %s962_s3 = inlined_call_operand.vmem [shape: f32[8,64], index: 3, kind: input, shape index: {}]   ;;  %s963_s4 = inlined_call_operand.vmem [shape: f32[64,64], index: 4, kind: input, shape index: {}]   ;;  %s964_s5 = inlined_call_operand.vmem [shape: f32[1,64], index: 5, kind: output, shape index: {}]  }
   0x1   :  { %v20_v0 = vld [vmem:[%s959_s1] sm:$0xff]  ;;  %v21_v1 = vld [vmem:[%s959_s1 + $0x8] sm:$0xff]  ;;  %vm792_vm1 = vmpackc.low %vm22_vm0, %vm22_vm0  ;;  %vm578_vm5 = vcmask 523264   ;;  %vm673_vm6 = vcmask 516096  }
   0x2   :  { %v791_v2 = vpack.c.bf16 %v21_v1, %v20_v0  ;;  %736 = vmatprep.mubr.msk.f32.mxu0 %vm22_vm0, %v20_v0  ;;  %v879_v3 = vld [vmem:[%s960_s0] sm:$0xff]  ;;  %v884_v4 = vld [vmem:[%s960_s0 + $0x8] sm:$0xff]  ;;  %v889_v5 = vld [vmem:[%s960_s0 + $0x10] sm:$0xff]  ;;  %v135_v44 = vshrl.u32 %v134_v41, 7  ;;  %v138_v48 = vand.u32 127, %v134_v41 }
   0x3   :  { %v797_v6 = vpack.c.bf16 %v884_v4, %v879_v3  ;;  %v896_v7 = vld [vmem:[%s960_s0 + $0x18] sm:$0xff]  ;;  %750 = vmatprep.mubr.msk.f32.mxu1 %vm106_vm2, %v889_v5  ;;  %v328_v9 = vld [vmem:[%s961_s2] sm:$0xff]  ;;  %v329_v10 = vld [vmem:[%s961_s2 + $0x8] sm:$0xff] }
   0x4   :  { %793 = vmatprep.subr.msk.bf16.mxu0 %vm792_vm1, %v791_v2  ;;  %v801_v8 = vpack.c.bf16 %v896_v7, %v889_v5  ;;  %v805_v11 = vpack.c.bf16 %v329_v10, %v328_v9  ;;  %v411_v12 = vld [vmem:[%s962_s3] sm:$0xff]  ;;  %v136_v47 = vadd.s32 8, %v135_v44  ;;  %vm139_vm4 = vcmp.eq.s32.totalorder %v135_v44, %v138_v48 }
   0x5   :  { %796 = vmatpush3.bf16.xpose.msk.msra.mxu0 %vm792_vm1, %v791_v2  ;;  %v683_v51 = vsel %vm139_vm4, 1.0, %v836_v49 }
   0x6   :  { %798 = vmatprep.subr.bf16.mxu0 %v797_v6  ;;  %802 = vmatprep.subr.bf16.mxu1 %v801_v8  ;;  %vm140_vm3 = vcmp.eq.s32.totalorder %v136_v47, %v138_v48  ;;  %v145_v53 = vmul.f32 -1.0, %v683_v51 }
   0x7   :  { %804 = vmatpush3.bf16.msra.mxu1 %v801_v8  ;;  %v684_v50 = vsel %vm140_vm3, 1.0, %v836_v49 }
   0x8   :  { %760 = vmatprep.subr.mxu1 %v411_v12  ;;  %v146_v52 = vmul.f32 -1.0, %v684_v50 }
   0xa   :  { %751 = vmatmul.mubr.msk.f32.vlgmr.msra.gmra.mrb[0].mxu1 %vm106_vm2, %v896_v7 }
   0xb   :  { %761 = vmatpush3.msra.mxu1 %v411_v12 }
   0xc   :  { %737 = vmatmul.mubr.msk.f32.vlgmr.msra.gmra.mrb[0].mxu0 %vm22_vm0, %v21_v1 }
   0xd   :  { %800 = vmatpush3.bf16.msra.mxu0 %v797_v6  ;;  %743 = vmatprep.mubr.msk.f32.mxu0 %vm106_vm2, %v879_v3 }
   0xe   :  { %806 = vmatprep.subr.bf16.mxu0 %v805_v11 }
  0x10   :  { %744 = vmatmul.mubr.msk.f32.vlgmr.msra.gmra.mrb[2].mxu0 %vm106_vm2, %v884_v4 }
  0x11   :  { %808 = vmatpush3.bf16.msra.mxu0 %v805_v11 }
  0xdd   :  { %v752_v13 = vpop.f32.mrb[0].mxu1 }
  0xde   :  { %v315_v14 = vpop.f32.mrb[1].mxu1  ;;  %v325_v1 = vmul.f32 2.0, %v752_v13  ;;  %v573_v13 = vld [vmem:[%s963_s4 + $0x18] sm:$0xff] }
  0xdf   :  { %v738_v15 = vpop.f32.mrb[0].mxu0  ;;  %v324_v2 = vmul.f32 2.0, %v315_v14 }
  0xe0   :  { %v105_v16 = vmax.f32 %v738_v15, 0.0  ;;  %v95_v17 = vpop.f32.mrb[1].mxu0  ;;  %v574_v15 = vld [vmem:[%s963_s4 + $0x20] sm:$0xff] }
  0xe1   :  { %v104_v18 = vmax.f32 %v95_v17, 0.0 }
  0xe2   :  { %v108_v19 = vsel %vm106_vm2, %v105_v16, -inf }
  0xe3   :  { %v107_v20 = vsel %vm106_vm2, %v104_v18, -inf  ;;  %v745_v21 = vpop.f32.mrb[2].mxu0 }
  0xe4   :  { %v109_v22 = vmax.f32 %v107_v20, %v108_v19  ;;  %v225_v23 = vpop.f32.mrb[3].mxu0  ;;  %v235_v58 = vmul.f32 2.0, %v745_v21  ;;  %v577_v19 = vld [vmem:[%s963_s4 + $0x38] sm:$0xff] }
  0xe5   :  { %v234_v60 = vmul.f32 2.0, %v225_v23 }
  0xe6   :  { %v110_v24 = vrot.slane %v109_v22, 4 }
  0xe8   :  { %v111_v25 = vmax.f32 %v109_v22, %v110_v24 }
  0xea   :  { %v112_v26 = vrot.slane %v111_v25, 2 }
  0xec   :  { %v113_v27 = vmax.f32 %v111_v25, %v112_v26 }
  0xee   :  { %v114_v28 = vrot.slane %v113_v27, 1 }
  0xf0   :  { %v115_v29 = vmax.f32 %v113_v27, %v114_v28 }
  0xf2   :  { %v116_v30 = vsub.f32 %v104_v18, %v115_v29  ;;  %v117_v31 = vsub.f32 %v105_v16, %v115_v29  ;;  %v575_v16 = vld [vmem:[%s963_s4 + $0x28] sm:$0xff]  ;;  %v576_v18 = vld [vmem:[%s963_s4 + $0x30] sm:$0xff] }
  0xf3   :  { %v821_v17 = vpack.c.bf16 %v575_v16, %v574_v15  ;;  %v825_v20 = vpack.c.bf16 %v577_v19, %v576_v18 }
  0xf4   :  { %v118_v32 = vmul.f32 1.442695, %v116_v30  ;;  %v120_v33 = vmul.f32 1.442695, %v117_v31 }
  0xf6   :  { %830 = vpow2.f32 %v118_v32 }
  0xf7   :  { %832 = vpow2.f32 %v120_v33 }
 0x100   :  { %v831_v34 = vpop.eup %830 }
 0x101   :  { %v833_v35 = vpop.eup %832  ;;  %v122_v36 = vsel %vm106_vm2, %v831_v34, 0.0 }
 0x102   :  { %v123_v37 = vsel %vm106_vm2, %v833_v35, 0.0 }
 0x103   :  { %v124_v38 = vadd.f32 %v123_v37, %v122_v36 }
 0x105   :  { %v125_v39 = vrot.slane %v124_v38, 4 }
 0x107   :  { %v126_v40 = vadd.f32 %v125_v39, %v124_v38 }
 0x109   :  { %v127_v42 = vrot.slane %v126_v40, 2 }
 0x10b   :  { %v128_v43 = vadd.f32 %v127_v42, %v126_v40 }
 0x10d   :  { %v129_v45 = vrot.slane %v128_v43, 1 }
 0x10f   :  { %v130_v46 = vadd.f32 %v129_v45, %v128_v43 }
 0x111   :  { %834 = vrcp.f32 %v130_v46 }
 0x11b   :  { %v835_v54 = vpop.eup %834 }
 0x11c   :  { %v133_v55 = vmul.f32 %v835_v54, %v833_v35  ;;  %v132_v56 = vmul.f32 %v835_v54, %v831_v34 }
 0x11e   :  { %v148_v57 = vadd.f32 %v146_v52, %v133_v55  ;;  %v147_v59 = vadd.f32 %v145_v53, %v132_v56 }
 0x120   :  { %v152_v61 = vadd.f32 %v884_v4, %v148_v57  ;;  %v151_v62 = vadd.f32 %v879_v3, %v147_v59  ;;  %v570_v3 = vld [vmem:[%s963_s4] sm:$0xff] }
 0x122   :  { %v237_v63 = vadd.f32 %v235_v58, %v152_v61  ;;  %v236_v0 = vadd.f32 %v234_v60, %v151_v62 }
 0x124   :  { %v242_v6 = vadd.f32 %v896_v7, %v237_v63  ;;  %v241_v8 = vadd.f32 %v889_v5, %v236_v0  ;;  %v571_v5 = vld [vmem:[%s963_s4 + $0x8] sm:$0xff]  ;;  %v572_v7 = vld [vmem:[%s963_s4 + $0x10] sm:$0xff] }
 0x125   :  { %v813_v12 = vpack.c.bf16 %v571_v5, %v570_v3  ;;  %v817_v14 = vpack.c.bf16 %v573_v13, %v572_v7 }
 0x126   :  { %v327_v9 = vadd.f32 %v325_v1, %v242_v6  ;;  %v326_v10 = vadd.f32 %v324_v2, %v241_v8 }
 0x127   :  { %814 = vmatprep.subr.bf16.mxu1 %v813_v12 }
 0x128   :  { %757 = vmatprep.mubr.msk.f32.mxu0 %vm106_vm2, %v326_v10 }
 0x129   :  { %758 = vmatmul.mubr.msk.f32.vlgmr.msra.gmra.mrb[4].mxu0 %vm106_vm2, %v327_v9 }
 0x12a   :  { %769 = vmatprep.mubr.msk.f32.mxu0 %vm106_vm2, %v326_v10 }
 0x1fc   :  { %v759_v11 = vpop.f32.mrb[4].mxu0 }
 0x1fd   :  { %v402_v4 = vpop.f32.mrb[5].mxu0 }
 0x1fe   :  { %762 = vmatprep.mubr.msk.f32.mxu1 %vm22_vm0, %v402_v4 }
 0x1ff   :  { %763 = vmatmul.mubr.msk.f32.vlgmr.msra.gmra.mrb[2].mxu1 %vm22_vm0, %v759_v11 }
 0x200   :  { %816 = vmatpush3.bf16.msra.mxu1 %v813_v12 }
 0x201   :  { %818 = vmatprep.subr.bf16.mxu1 %v817_v14 }
 0x204   :  { %820 = vmatpush3.bf16.msra.mxu1 %v817_v14 }
 0x205   :  { %822 = vmatprep.subr.bf16.mxu1 %v821_v17 }
 0x208   :  { %824 = vmatpush3.bf16.msra.mxu1 %v821_v17 }
 0x209   :  { %826 = vmatprep.subr.bf16.mxu1 %v825_v20 }
 0x20c   :  { %828 = vmatpush3.bf16.msra.mxu1 %v825_v20 }
 0x2d2   :  { %v764_v21 = vpop.f32.mrb[2].mxu1 }
 0x2d3   :  { %v494_v22 = vmax.f32 %v764_v21, 0.0  ;;  %v484_v23 = vpop.f32.mrb[3].mxu1 }
 0x2d4   :  { %v493_v24 = vmax.f32 %v484_v23, 0.0 }
 0x2d6   :  { %v809_v25 = vpack.c.bf16 %v494_v22, %v493_v24 }
 0x2d8   :  { %810 = vmatprep.subr.bf16.mxu0 %v809_v25 }
 0x2d9   :  { %812 = vmatpush3.bf16.msra.mxu0 %v809_v25 }
 0x2dc   :  { %770 = vmatmul.mubr.msk.f32.vlgmr.msra.gmra.mrb[6].mxu0 %vm106_vm2, %v327_v9 }
 0x3af   :  { %v771_v26 = vpop.f32.mrb[6].mxu0 }
 0x3b0   :  { %v561_v27 = vpop.f32.mrb[7].mxu0 }
 0x3b1   :  { %788 = vmatprep.mubr.msk.f32.mxu1 %vm578_vm5, %v561_v27 }
 0x3b2   :  { %789 = vmatmul.mubr.msk.f32.vlgmr.msra.gmra.mrb[4].mxu1 %vm578_vm5, %v771_v26 }
 0x485   :  { %v790_v28 = vpop.f32.mrb[4].mxu1 }
 0x486   :  { %v661_v29 = vmax.f32 %v790_v28, 0.0  ;;  %v651_v30 = vpop.f32.mrb[5].mxu1 }
 0x487   :  { %v660_v31 = vmax.f32 %v651_v30, 0.0 }
 0x488   :  { %v663_v32 = vsel %vm578_vm5, %v661_v29, 0.0 }
 0x489   :  { %v662_v33 = vsel %vm578_vm5, %v660_v31, 0.0 }
 0x48a   :  { %v664_v34 = vadd.f32 %v663_v32, %v662_v33 }
 0x48c   :  { %v665_v35 = vrot.slane %v664_v34, 4 }
 0x48e   :  { %v666_v36 = vadd.f32 %v665_v35, %v664_v34 }
 0x490   :  { %v667_v37 = vrot.slane %v666_v36, 2 }
 0x492   :  { %v668_v38 = vadd.f32 %v667_v37, %v666_v36 }
 0x494   :  { %v669_v39 = vrot.slane %v668_v38, 1 }
 0x496   :  { %v670_v40 = vadd.f32 %v669_v39, %v668_v38 }
 0x498   :  { %v672_v41 = vmul.f32 0.0625, %v670_v40 }
 0x49a   :  { %674 = vst.msk [vmem:[%s964_s5] sm:$0x1] %vm673_vm6, %v672_v41 }

</bundles_post_ra>
